<compile_context>
chip_gen: v7x
topology: tpu7x:2x2x1
jax: 0.10.0
libtpu: 0.0.40
codegen_flags: <defaults>
</compile_context>

<pallas_src>
import functools
import math

import jax
import jax.numpy as jnp
from jax.experimental import pallas as pl
from jax.experimental.pallas import tpu as pltpu

LANE = 128
SUBLANE = 8
CHUNK = 1024                    # rows per in-block compute chunk
_PAD_GRAN = SUBLANE * LANE      # pad flattened inputs to a multiple of this (1024)


def _hw_config():
    """(num_cores_axis, tile_rows, vmem_limit_bytes) per TPU generation."""
    try:
        kind = jax.devices()[0].device_kind.lower()
    except Exception:
        kind = ""
    if "v7" in kind or "tpu7" in kind or "7x" in kind:
        # 2 TensorCores / chip, 64 MiB VMEM per core -> leave headroom.
        return 2, 8192, 40 * 1024 * 1024
    if "v6" in kind:
        return 1, 8192, 40 * 1024 * 1024
    if "v5e" in kind or "v5 lite" in kind or "v5lite" in kind:
        return 1, 4096, 32 * 1024 * 1024
    if "v5" in kind or "v4" in kind:       # v5p / v4 (megacore)
        return 2, 4096, 32 * 1024 * 1024
    return 1, 2048, None                   # unknown / older: conservative


def _loss_kernel(x_ref, t_ref, o_ref, acc_ref, *, tr, chunk, npc, nb, rows_last):
    """Grid = (cores, blocks-per-core); reduction axis last.

    acc_ref is a (4*SUBLANE, LANE) f32 VMEM scratch holding, per 128 lanes:
      rows  0.. 7 : count(target > 0)
      rows  8..15 : count(target == 0)
      rows 16..23 : sum of bce over positive elements
      rows 24..31 : sum of bce over zero elements
    (f32 counts stay exact up to 2**24 per lane per core, i.e. ~4e9 total
    elements -- fine for any realistic activation tensor.)
    """
    c = pl.program_id(0)          # core / parallel axis
    i = pl.program_id(1)          # reduction axis (last)
    blk = c * npc + i             # unclamped global block index

    has_tail = rows_last < tr     # static python bool
    nchunks = tr // chunk         # static
    use_mxu = chunk >= 512        # static; skip MXU path for tiny inputs

    @pl.when(i == 0)
    def _():
        acc_ref[...] = jnp.zeros_like(acc_ref)

    ones = jnp.ones((SUBLANE, chunk), jnp.float32) if use_mxu else None

    def rsum8(q):
        # (chunk, LANE) -> (SUBLANE, LANE); reshape is (8,128)-tile aligned.
        return jnp.sum(q.reshape(chunk // SUBLANE, SUBLANE, LANE), axis=0)

    def accumulate(x, t):
        pos = (t > 0.0).astype(jnp.float32)
        neg = (t == 0.0).astype(jnp.float32)
        # numerically stable binary cross entropy with logits
        bce = jnp.maximum(x, 0.0) - x * t + jnp.log1p(jnp.exp(-jnp.abs(x)))
        if use_mxu:
            # 0/1 counts are exact at any matmul precision -> idle MXU.
            cnt_pos = jnp.dot(ones, pos, preferred_element_type=jnp.float32)
            cnt_neg = jnp.dot(ones, neg, preferred_element_type=jnp.float32)
        else:
            cnt_pos = rsum8(pos)
            cnt_neg = rsum8(neg)
        # Full-sublane (8,128) accumulator slices: no masked partial stores.
        acc_ref[0 * SUBLANE:1 * SUBLANE, :] += cnt_pos
        acc_ref[1 * SUBLANE:2 * SUBLANE, :] += cnt_neg
        # Weighted-bce partial sums stay on the VALU in f32 for accuracy.
        acc_ref[2 * SUBLANE:3 * SUBLANE, :] += rsum8(pos * bce)
        acc_ref[3 * SUBLANE:4 * SUBLANE, :] += rsum8(neg * bce)

    # Fast path: fully in-range blocks, no masking whatsoever.  Duplicate
    # (clamped) blocks on the core axis fail both conditions and are skipped.
    fast_cond = (blk < nb - 1) if has_tail else (blk < nb)

    @pl.when(fast_cond)
    def _():
        @pl.loop(0, nchunks)
        def _(j):
            r0 = pl.multiple_of(j * chunk, chunk)
            accumulate(x_ref[pl.ds(r0, chunk), :].astype(jnp.float32),
                       t_ref[pl.ds(r0, chunk), :].astype(jnp.float32))

    if has_tail:
        # Only the single ragged last block pays for a (row-level) mask.  Rows
        # past `rows_last` in this block are out-of-bounds garbage in VMEM, so
        # neutralize both operands before any arithmetic (t=-1 -> pos=neg=0).
        n_tail_chunks = pl.cdiv(rows_last, chunk)    # static

        @pl.when(blk == nb - 1)
        def _():
            @pl.loop(0, n_tail_chunks)
            def _(j):
                r0 = pl.multiple_of(j * chunk, chunk)
                rid = jax.lax.broadcasted_iota(jnp.int32, (chunk, LANE), 0)
                valid = (j * chunk + rid) < rows_last
                x = jnp.where(valid, x_ref[pl.ds(r0, chunk), :].astype(jnp.float32), 0.0)
                t = jnp.where(valid, t_ref[pl.ds(r0, chunk), :].astype(jnp.float32), -1.0)
                accumulate(x, t)

    @pl.when(i == npc - 1)
    def _():
        o_ref[...] = acc_ref[...]


@jax.jit
def weighted_bce_loss(logits, targets):
    """Pallas equivalent of Loss.forward(input, target)."""
    assert logits.shape == targets.shape
    total = math.prod(logits.shape)
    cores, tile_rows, vmem_limit = _hw_config()

    # Flatten in native NCHW order: the weighted mean is order-invariant, so
    # the PyTorch transpose chain is unnecessary (it would only add HBM copies).
    x = logits.reshape(-1)
    t = targets.reshape(-1)

    # Pad (a copy) only when needed.  Targets are padded with -1.0 so padded
    # elements are neither "positive" nor "zero" and contribute nothing; this
    # removes any need for a lane-level mask in the kernel.  Padding to a
    # multiple of 8*128 also keeps `rows` a multiple of 8.
    rem = total % _PAD_GRAN
    if rem:
        pad = _PAD_GRAN - rem
        x = jnp.pad(x, (0, pad), constant_values=0)
        t = jnp.pad(t, (0, pad), constant_values=-1)

    rows = x.shape[0] // LANE
    x = x.reshape(rows, LANE)
    t = t.reshape(rows, LANE)

    # Tiling: tr is a multiple of chunk so in-block compute chunks never slice
    # past the block ref; the last data block may be ragged w.r.t. the array.
    chunk = CHUNK if rows >= CHUNK else rows
    tr = min(tile_rows, rows)
    tr -= tr % chunk
    nb = pl.cdiv(rows, tr)            # number of data blocks
    npc = pl.cdiv(nb, cores)          # blocks per core
    rows_last = rows - (nb - 1) * tr  # valid rows in the last (ragged) block

    def in_map(c, i):
        # Clamp so the automatic DMA never starts past the array; the kernel
        # skips the duplicated (clamped) blocks via its unclamped block index.
        return (jnp.minimum(c * npc + i, nb - 1), 0)

    kernel = functools.partial(_loss_kernel, tr=tr, chunk=chunk, npc=npc,
                               nb=nb, rows_last=rows_last)

    cp = dict(dimension_semantics=("parallel", "arbitrary"))
    if vmem_limit is not None:
        cp["vmem_limit_bytes"] = vmem_limit
    # TODO(synk): confirm with xprof that the leading "parallel" axis really
    # splits across v7x's two TensorCores; if not, switch that axis to
    # pltpu.CORE_PARALLEL / pl.core_map (output layout already per-core).

    partials = pl.pallas_call(
        kernel,
        out_shape=jax.ShapeDtypeStruct((cores * 4 * SUBLANE, LANE), jnp.float32),
        grid_spec=pltpu.PrefetchScalarGridSpec(
            num_scalar_prefetch=0,
            grid=(cores, npc),
            in_specs=[pl.BlockSpec((tr, LANE), in_map),
                      pl.BlockSpec((tr, LANE), in_map)],
            out_specs=pl.BlockSpec((4 * SUBLANE, LANE), lambda c, i: (c, 0)),
            scratch_shapes=[pltpu.VMEM((4 * SUBLANE, LANE), jnp.float32)],
        ),
        compiler_params=pltpu.CompilerParams(**cp),
    )(x, t)

    sums = jnp.sum(partials.reshape(cores, 4, SUBLANE, LANE), axis=(0, 2, 3))
    pos_num, neg_num, pos_bce, neg_bce = sums[0], sums[1], sums[2], sums[3]
    sum_num = pos_num + neg_num
    # size_average=True -> mean over ALL n*c*h*w elements.
    return ((neg_num / sum_num) * pos_bce + (pos_num / sum_num) * neg_bce) / total


def _reference_loss(logits, targets):
    """Pure-JAX reference reproducing the PyTorch forward exactly."""
    x = jnp.transpose(logits, (0, 2, 3, 1)).reshape(-1).astype(jnp.float32)
    t = jnp.transpose(targets, (0, 2, 3, 1)).reshape(-1).astype(jnp.float32)
    pos = t > 0
    neg = t == 0
    pos_num = jnp.sum(pos)
    neg_num = jnp.sum(neg)
    sum_num = pos_num + neg_num
    weight = jnp.where(pos, neg_num / sum_num,
                       jnp.where(neg, pos_num / sum_num, 0.0)).astype(jnp.float32)
    bce = jnp.maximum(x, 0.0) - x * t + jnp.log1p(jnp.exp(-jnp.abs(x)))
    return jnp.sum(weight * bce) / x.size


if __name__ == "__main__":
    # Note: the PyTorch module's constructor arg weight=[1.0]*7 is unused by
    # forward(), so it has no counterpart here.
    key = jax.random.PRNGKey(0)
    k = jax.random.split(key, 6)

    # main check: NCHW = (2, 4, 16, 16)
    n, c, h, w = 2, 4, 16, 16
    logits = jax.random.normal(k[0], (n, c, h, w), dtype=jnp.float32)
    targets = (jax.random.uniform(k[1], (n, c, h, w)) > 0.7).astype(jnp.float32)
    loss = jax.block_until_ready(weighted_bce_loss(logits, targets))
    ref = jax.block_until_ready(_reference_loss(logits, targets))
    assert jnp.allclose(loss, ref, rtol=1e-5, atol=1e-6), (loss, ref)

    # odd small shape: exercises lane-tail padding (targets padded with -1)
    logits2 = jax.random.normal(k[2], (1, 3, 7, 5), dtype=jnp.float32)
    targets2 = (jax.random.uniform(k[3], (1, 3, 7, 5)) > 0.6).astype(jnp.float32)
    loss2 = jax.block_until_ready(weighted_bce_loss(logits2, targets2))
    ref2 = jax.block_until_ready(_reference_loss(logits2, targets2))
    assert jnp.allclose(loss2, ref2, rtol=1e-5, atol=1e-6), (loss2, ref2)

    # larger odd shape: exercises the unmasked multi-block fast path, the MXU
    # count reduction, the duplicate-block skip and the ragged-last-block mask.
    logits3 = jax.random.normal(k[4], (2, 5, 333, 353), dtype=jnp.float32)
    targets3 = (jax.random.uniform(k[5], (2, 5, 333, 353)) > 0.7).astype(jnp.float32)
    loss3 = jax.block_until_ready(weighted_bce_loss(logits3, targets3))
    ref3 = jax.block_until_ready(_reference_loss(logits3, targets3))
    assert jnp.allclose(loss3, ref3, rtol=1e-4, atol=1e-6), (loss3, ref3)

    print("KERNEL_OK")
</pallas_src>

<mosaic_0001>
module attributes {stable_mosaic.version = 11 : i64} {
  func.func @_loss_kernel(%arg0: i32, %arg1: i32, %arg2: memref<16x128xf32, #tpu.memory_space<vmem>>, %arg3: memref<16x128xf32, #tpu.memory_space<vmem>>, %arg4: memref<32x128xf32, #tpu.memory_space<vmem>>, %arg5: memref<32x128xf32, #tpu.memory_space<vmem>>) attributes {dimension_semantics = [#tpu.dimension_semantics<parallel>, #tpu.dimension_semantics<arbitrary>], iteration_bounds = array<i64: 1, 1>, scalar_prefetch = 0 : i64, scratch_operands = 1 : i64, tpu.core_type = #tpu.core_type<tc>, window_params = [{transform_indices = @transform_0, window_bounds = array<i64: 16, 128>}, {transform_indices = @transform_1, window_bounds = array<i64: 16, 128>}, {transform_indices = @transform_2, window_bounds = array<i64: 32, 128>}]} {
    %c1_i32 = arith.constant 1 : i32
    %0 = arith.muli %arg0, %c1_i32 : i32
    %1 = arith.addi %0, %arg1 : i32
    %c0_i32 = arith.constant 0 : i32
    %2 = arith.cmpi eq, %arg1, %c0_i32 : i32
    %3 = arith.extui %2 : i1 to i32
    %c0_i32_0 = arith.constant 0 : i32
    %4 = arith.cmpi ne, %3, %c0_i32_0 : i32
    scf.if %4 {
      %cst = arith.constant 0.000000e+00 : f32
      %11 = vector.broadcast %cst : f32 to vector<32x128xf32>
      %c0 = arith.constant 0 : index
      %c0_5 = arith.constant 0 : index
      %12 = vector.load %arg5[%c0, %c0_5] : memref<32x128xf32, #tpu.memory_space<vmem>>, vector<32x128xf32>
      tpu.vector_store %arg5[%c0, %c0_5], %11 {strides = array<i32>} : memref<32x128xf32, #tpu.memory_space<vmem>>, vector<32x128xf32>,
    } else {
    }
    %c1_i32_1 = arith.constant 1 : i32
    %5 = arith.cmpi slt, %1, %c1_i32_1 : i32
    %6 = arith.extui %5 : i1 to i32
    %c0_i32_2 = arith.constant 0 : i32
    %7 = arith.cmpi ne, %6, %c0_i32_2 : i32
    scf.if %7 {
      %c0_i32_5 = arith.constant 0 : i32
      %c1_i32_6 = arith.constant 1 : i32
      %11 = arith.muli %c0_i32_5, %c1_i32_6 : i32
      %c0_i32_7 = arith.constant 0 : i32
      %12 = arith.addi %c0_i32_7, %11 : i32
      %c16_i32 = arith.constant 16 : i32
      %13 = arith.muli %12, %c16_i32 : i32
      %14 = tpu.assume_multiple %13, 16 : i32
      %15 = arith.index_cast %14 : i32 to index
      %c0 = arith.constant 0 : index
      %16 = vector.load %arg2[%15, %c0] : memref<16x128xf32, #tpu.memory_space<vmem>>, vector<16x128xf32>
      %17 = arith.index_cast %14 : i32 to index
      %c0_8 = arith.constant 0 : index
      %18 = vector.load %arg3[%17, %c0_8] : memref<16x128xf32, #tpu.memory_space<vmem>>, vector<16x128xf32>
      %cst = arith.constant 0.000000e+00 : f32
      %19 = vector.broadcast %cst : f32 to vector<16x128xf32>
      %20 = arith.cmpf ogt, %18, %19 : vector<16x128xf32>
      %21 = arith.extui %20 : vector<16x128xi1> to vector<16x128xi32>
      %22 = arith.sitofp %21 : vector<16x128xi32> to vector<16x128xf32>
      %cst_9 = arith.constant 0.000000e+00 : f32
      %23 = vector.broadcast %cst_9 : f32 to vector<16x128xf32>
      %24 = arith.cmpf oeq, %18, %23 : vector<16x128xf32>
      %25 = arith.extui %24 : vector<16x128xi1> to vector<16x128xi32>
      %26 = arith.sitofp %25 : vector<16x128xi32> to vector<16x128xf32>
      %cst_10 = arith.constant 0.000000e+00 : f32
      %27 = vector.broadcast %cst_10 : f32 to vector<16x128xf32>
      %28 = arith.maximumf %16, %27 : vector<16x128xf32>
      %29 = arith.mulf %16, %18 : vector<16x128xf32>
      %30 = arith.subf %28, %29 : vector<16x128xf32>
      %31 = math.absf %16 : vector<16x128xf32>
      %cst_11 = arith.constant 0.000000e+00 : f32
      %32 = vector.broadcast %cst_11 : f32 to vector<16x128xf32>
      %33 = arith.subf %32, %31 : vector<16x128xf32>
      %34 = math.exp %33 : vector<16x128xf32>
      %35 = math.log1p %34 : vector<16x128xf32>
      %36 = arith.addf %30, %35 : vector<16x128xf32>
      %37 = vector.shape_cast %22 : vector<16x128xf32> to vector<2x8x128xf32>
      %cst_12 = arith.constant dense<0.000000e+00> : vector<8x128xf32>
      %38 = vector.multi_reduction <add>, %37, %cst_12 [0] : vector<2x8x128xf32> to vector<8x128xf32>
      %39 = vector.shape_cast %26 : vector<16x128xf32> to vector<2x8x128xf32>
      %cst_13 = arith.constant dense<0.000000e+00> : vector<8x128xf32>
      %40 = vector.multi_reduction <add>, %39, %cst_13 [0] : vector<2x8x128xf32> to vector<8x128xf32>
      %c0_14 = arith.constant 0 : index
      %c0_15 = arith.constant 0 : index
      %41 = vector.load %arg5[%c0_14, %c0_15] : memref<32x128xf32, #tpu.memory_space<vmem>>, vector<8x128xf32>
      %42 = arith.addf %41, %38 : vector<8x128xf32>
      %c0_16 = arith.constant 0 : index
      %c0_17 = arith.constant 0 : index
      %43 = vector.load %arg5[%c0_16, %c0_17] : memref<32x128xf32, #tpu.memory_space<vmem>>, vector<8x128xf32>
      tpu.vector_store %arg5[%c0_16, %c0_17], %42 {strides = array<i32>} : memref<32x128xf32, #tpu.memory_space<vmem>>, vector<8x128xf32>,
      %c8 = arith.constant 8 : index
      %c0_18 = arith.constant 0 : index
      %44 = vector.load %arg5[%c8, %c0_18] : memref<32x128xf32, #tpu.memory_space<vmem>>, vector<8x128xf32>
      %45 = arith.addf %44, %40 : vector<8x128xf32>
      %c8_19 = arith.constant 8 : index
      %c0_20 = arith.constant 0 : index
      %46 = vector.load %arg5[%c8_19, %c0_20] : memref<32x128xf32, #tpu.memory_space<vmem>>, vector<8x128xf32>
      tpu.vector_store %arg5[%c8_19, %c0_20], %45 {strides = array<i32>} : memref<32x128xf32, #tpu.memory_space<vmem>>, vector<8x128xf32>,
      %c16 = arith.constant 16 : index
      %c0_21 = arith.constant 0 : index
      %47 = vector.load %arg5[%c16, %c0_21] : memref<32x128xf32, #tpu.memory_space<vmem>>, vector<8x128xf32>
      %48 = arith.mulf %22, %36 : vector<16x128xf32>
      %49 = vector.shape_cast %48 : vector<16x128xf32> to vector<2x8x128xf32>
      %cst_22 = arith.constant dense<0.000000e+00> : vector<8x128xf32>
      %50 = vector.multi_reduction <add>, %49, %cst_22 [0] : vector<2x8x128xf32> to vector<8x128xf32>
      %51 = arith.addf %47, %50 : vector<8x128xf32>
      %c16_23 = arith.constant 16 : index
      %c0_24 = arith.constant 0 : index
      %52 = vector.load %arg5[%c16_23, %c0_24] : memref<32x128xf32, #tpu.memory_space<vmem>>, vector<8x128xf32>
      tpu.vector_store %arg5[%c16_23, %c0_24], %51 {strides = array<i32>} : memref<32x128xf32, #tpu.memory_space<vmem>>, vector<8x128xf32>,
      %c24 = arith.constant 24 : index
      %c0_25 = arith.constant 0 : index
      %53 = vector.load %arg5[%c24, %c0_25] : memref<32x128xf32, #tpu.memory_space<vmem>>, vector<8x128xf32>
      %54 = arith.mulf %26, %36 : vector<16x128xf32>
      %55 = vector.shape_cast %54 : vector<16x128xf32> to vector<2x8x128xf32>
      %cst_26 = arith.constant dense<0.000000e+00> : vector<8x128xf32>
      %56 = vector.multi_reduction <add>, %55, %cst_26 [0] : vector<2x8x128xf32> to vector<8x128xf32>
      %57 = arith.addf %53, %56 : vector<8x128xf32>
      %c24_27 = arith.constant 24 : index
      %c0_28 = arith.constant 0 : index
      %58 = vector.load %arg5[%c24_27, %c0_28] : memref<32x128xf32, #tpu.memory_space<vmem>>, vector<8x128xf32>
      tpu.vector_store %arg5[%c24_27, %c0_28], %57 {strides = array<i32>} : memref<32x128xf32, #tpu.memory_space<vmem>>, vector<8x128xf32>,
      %c1_i32_29 = arith.constant 1 : i32
    } else {
    }
    %c0_i32_3 = arith.constant 0 : i32
    %8 = arith.cmpi eq, %arg1, %c0_i32_3 : i32
    %9 = arith.extui %8 : i1 to i32
    %c0_i32_4 = arith.constant 0 : i32
    %10 = arith.cmpi ne, %9, %c0_i32_4 : i32
    scf.if %10 {
      %c0 = arith.constant 0 : index
      %c0_5 = arith.constant 0 : index
      %11 = vector.load %arg5[%c0, %c0_5] : memref<32x128xf32, #tpu.memory_space<vmem>>, vector<32x128xf32>
      %c0_6 = arith.constant 0 : index
      %c0_7 = arith.constant 0 : index
      %12 = vector.load %arg4[%c0_6, %c0_7] : memref<32x128xf32, #tpu.memory_space<vmem>>, vector<32x128xf32>
      tpu.vector_store %arg4[%c0_6, %c0_7], %11 {strides = array<i32>} : memref<32x128xf32, #tpu.memory_space<vmem>>, vector<32x128xf32>,
    } else {
    }
    return
  }
  func.func @transform_0(%arg0: i32, %arg1: i32) -> (i32, i32) {
    %c1_i32 = arith.constant 1 : i32
    %0 = arith.muli %arg0, %c1_i32 : i32
    %1 = arith.addi %0, %arg1 : i32
    %c0_i32 = arith.constant 0 : i32
    %2 = arith.minsi %1, %c0_i32 : i32
    %c0_i32_0 = arith.constant 0 : i32
    %c0_i32_1 = arith.constant 0 : i32
    return %2, %c0_i32_0 : i32, i32
  }
  func.func @transform_1(%arg0: i32, %arg1: i32) -> (i32, i32) {
    %c1_i32 = arith.constant 1 : i32
    %0 = arith.muli %arg0, %c1_i32 : i32
    %1 = arith.addi %0, %arg1 : i32
    %c0_i32 = arith.constant 0 : i32
    %2 = arith.minsi %1, %c0_i32 : i32
    %c0_i32_0 = arith.constant 0 : i32
    %c0_i32_1 = arith.constant 0 : i32
    return %2, %c0_i32_0 : i32, i32
  }
  func.func @transform_2(%arg0: i32, %arg1: i32) -> (i32, i32) {
    %c0_i32 = arith.constant 0 : i32
    %c0_i32_0 = arith.constant 0 : i32
    return %arg0, %c0_i32 : i32, i32
  }
}

</mosaic_0001>

<bundles_post_ra>
// kernel: weighted_bce_loss.1
= control target key start
LH: loop header
LB: loop body
LE: loop exit
PB: predicated region body
PF: predicated region fallthrough
CT: control target
= control target key end

     0   :  { %v198_v6 = vmov 0.0   ;;  %s238_s0 = inlined_call_operand.vmem [shape: f32[16,128], index: 0, kind: input, shape index: {}]   ;;  %s239_s1 = inlined_call_operand.vmem [shape: f32[16,128], index: 1, kind: input, shape index: {}]   ;;  %s240_s2 = inlined_call_operand.vmem [shape: f32[32,128], index: 2, kind: output, shape index: {}]  }
   0x1   :  { %v88_v0 = vld [vmem:[%s238_s0] sm:$0xff]  ;;  %v89_v1 = vld [vmem:[%s238_s0 + $0x8] sm:$0xff] }
   0x2   :  { %v90_v2 = vld [vmem:[%s239_s1] sm:$0xff]  ;;  %v91_v3 = vld [vmem:[%s239_s1 + $0x8] sm:$0xff]  ;;  %v110_v4 = vand.u32 2147483647, %v88_v0  ;;  %v111_v5 = vand.u32 2147483647, %v89_v1 }
   0x3   :  { %vm92_vm0 = vcmp.gt.f32.partialorder %v90_v2, 0.0  ;;  %vm93_vm1 = vcmp.gt.f32.partialorder %v91_v3, 0.0  ;;  %vm98_vm2 = vcmp.eq.f32.partialorder %v90_v2, 0.0  ;;  %vm99_vm3 = vcmp.eq.f32.partialorder %v91_v3, 0.0 }
   0x4   :  { %v185_v7 = vsel %vm92_vm0, 1.0, %v198_v6  ;;  %v186_v8 = vsel %vm93_vm1, 1.0, %v198_v6  ;;  %v112_v9 = vsub.f32 0.0, %v110_v4  ;;  %v113_v10 = vsub.f32 0.0, %v111_v5 }
   0x5   :  { %v138_v11 = vadd.f32 %v186_v8, %v185_v7  ;;  %v187_v12 = vsel %vm98_vm2, 1.0, %v198_v6  ;;  %v188_v13 = vsel %vm99_vm3, 1.0, %v198_v6  ;;  %v106_v24 = vmul.f32 %v90_v2, %v88_v0 }
   0x6   :  { %v114_v14 = vmul.f32 1.442695, %v112_v9  ;;  %v116_v15 = vmul.f32 1.442695, %v113_v10  ;;  %v139_v16 = vadd.f32 %v188_v13, %v187_v12  ;;  %v104_v25 = vmax.f32 %v88_v0, 0.0 }
   0x7   :  { %165 = vst [vmem:[%s240_s2] sm:$0xff] %v138_v11  ;;  %v107_v28 = vmul.f32 %v91_v3, %v89_v1  ;;  %v105_v29 = vmax.f32 %v89_v1, 0.0 }
   0x8   :  { %190 = vpow2.f32 %v114_v14  ;;  %166 = vst [vmem:[%s240_s2 + $0x8] sm:$0xff] %v139_v16  ;;  %v108_v33 = vsub.f32 %v104_v25, %v106_v24 }
   0x9   :  { %192 = vpow2.f32 %v116_v15  ;;  %v109_v36 = vsub.f32 %v105_v29, %v107_v28 }
  0x12   :  { %v191_v17 = vpop.eup %190 }
  0x13   :  { %v193_v18 = vpop.eup %192  ;;  %v118_v19 = vadd.f32 1.0, %v191_v17  ;;  %v121_v21 = vmul.f32 -0.5, %v191_v17  ;;  %v124_v26 = vand.u32 2147483647, %v191_v17 }
  0x14   :  { %v127_v20 = vadd.f32 1.0, %v193_v18  ;;  %v130_v22 = vmul.f32 -0.5, %v193_v18  ;;  %v133_v30 = vand.u32 2147483647, %v193_v18 }
  0x15   :  { %194 = vlog2.f32 %v118_v19  ;;  %v122_v23 = vadd.f32 1.0, %v121_v21  ;;  %vm125_vm4 = vcmp.lt.f32.partialorder %v124_v26, 0.0004427343 }
  0x16   :  { %196 = vlog2.f32 %v127_v20  ;;  %v131_v27 = vadd.f32 1.0, %v130_v22  ;;  %vm134_vm5 = vcmp.lt.f32.partialorder %v133_v30, 0.0004427343 }
  0x17   :  { %v123_v31 = vmul.f32 %v191_v17, %v122_v23 }
  0x18   :  { %v132_v34 = vmul.f32 %v193_v18, %v131_v27 }
  0x1f   :  { %v195_v32 = vpop.eup %194 }
  0x20   :  { %v197_v35 = vpop.eup %196  ;;  %v120_v37 = vmul.f32 0.6931472, %v195_v32 }
  0x21   :  { %v129_v38 = vmul.f32 0.6931472, %v197_v35 }
  0x22   :  { %v126_v39 = vsel %vm125_vm4, %v123_v31, %v120_v37 }
  0x23   :  { %v135_v40 = vsel %vm134_vm5, %v132_v34, %v129_v38  ;;  %v136_v41 = vadd.f32 %v126_v39, %v108_v33 }
  0x24   :  { %v137_v42 = vadd.f32 %v135_v40, %v109_v36 }
  0x25   :  { %v147_v43 = vmul.f32 %v185_v7, %v136_v41  ;;  %v153_v44 = vmul.f32 %v187_v12, %v136_v41 }
  0x26   :  { %v148_v45 = vmul.f32 %v186_v8, %v137_v42  ;;  %v154_v46 = vmul.f32 %v188_v13, %v137_v42 }
  0x28   :  { %v149_v47 = vadd.f32 %v148_v45, %v147_v43  ;;  %v155_v48 = vadd.f32 %v154_v46, %v153_v44 }
  0x2a   :  { %167 = vst [vmem:[%s240_s2 + $0x10] sm:$0xff] %v149_v47  ;;  %168 = vst [vmem:[%s240_s2 + $0x18] sm:$0xff] %v155_v48 }

</bundles_post_ra>
